<compile_context>
chip_gen: v6e
topology: v6e:2x2x1
jax: 0.10.0
libtpu: 0.0.40
codegen_flags: <defaults>
</compile_context>

<pallas_src>
import functools

import jax
import jax.numpy as jnp
from jax.experimental import pallas as pl
from jax.experimental.pallas import tpu as pltpu


# ----------------------------------------------------------------------------
# Pallas kernel: one full forward step of the plastic RNN cell (one batch tile).
# ----------------------------------------------------------------------------
def network_kernel(x_ref, h_ref, hebb_ref,
                   wi2h_ref, bi2h_ref,
                   w_ref, alpha_ref,
                   wheads_ref, bheads_ref,
                   wmf_ref, bmf_ref,
                   heads_ref, hactiv_ref, hebb_out_ref,
                   *, num_actions):
    x = x_ref[...]            # (Bt, I)
    h = h_ref[...]            # (Bt, H)
    hebb = hebb_ref[...]      # (Bt, H, H)

    # Recurrent term  h @ (w + alpha*hebb)  split into:
    #   shared dense part on the MXU:        h @ w
    #   plastic part on VPU + XLU reduce:    sum_i h[:,i,None] * alpha * hebb
    rec = jnp.dot(h, w_ref[...], preferred_element_type=jnp.float32)        # (Bt, H)
    rec = rec + jnp.sum(h[:, :, None] * (alpha_ref[...][None, :, :] * hebb),
                        axis=1)                                              # (Bt, H)

    # hactiv = tanh(i2h(inputs) + recurrent)
    hactiv = jnp.tanh(
        jnp.dot(x, wi2h_ref[...], preferred_element_type=jnp.float32)
        + bi2h_ref[...] + rec)                                               # (Bt, H)

    # Fused heads: one matmul producing [h2o | h2v | h2mod] on the lanes.
    heads = (jnp.dot(hactiv, wheads_ref[...],
                     preferred_element_type=jnp.float32)
             + bheads_ref[...])                                              # (Bt, NA+2)

    # Neuromodulation. h2mod output is the last head column; modfanout is a
    # Linear(1, H), i.e. a broadcast multiply on the VPU (no K=1 MXU matmul).
    mod = jnp.tanh(heads[:, num_actions + 1:num_actions + 2])                # (Bt, 1)
    myeta = mod * wmf_ref[...] + bmf_ref[...]                                # (Bt, H)

    # Fused Hebbian update with clamp; deltahebb[b,i,j] = h[b,i]*hactiv[b,j],
    # eta broadcasts over the presynaptic (i) axis — no (Bt,H,H) temporary.
    g = myeta * hactiv                                                       # (Bt, H)
    hebb_out_ref[...] = jnp.clip(hebb + h[:, :, None] * g[:, None, :],
                                 -2.0, 2.0)

    heads_ref[...] = heads          # single lane-packed store for the heads
    hactiv_ref[...] = hactiv


# ----------------------------------------------------------------------------
# Wrapper
# ----------------------------------------------------------------------------
def network_forward(params, inputs, hidden, *, batch_tile=None):
    """Returns (activout, valueout, (hactiv, hebb_new)) like Network.forward."""
    h, hebb = hidden
    B, I = inputs.shape
    H = h.shape[1]
    NA = params["wh2o"].shape[1]
    NH = NA + 2                      # fused head width: [h2o | h2v | h2mod]

    # Fuse the three tiny head projections into one matmul's weights/biases.
    w_heads = jnp.concatenate([params["wh2o"], params["wh2v"], params["wh2mod"]],
                              axis=1)                                   # (H, NA+2)
    b_heads = jnp.concatenate([params["bh2o"], params["bh2v"], params["bh2mod"]],
                              axis=1)                                   # (1, NA+2)

    # Batch tiling: bounds (Bt,H,H) VMEM residency and lets megacore shard it.
    if batch_tile is None:
        batch_tile = B if B <= 8 else 8
    if B % batch_tile:
        batch_tile = B
    bt = batch_tile
    grid = (B // bt,)

    cost = pl.CostEstimate(
        flops=2 * B * H * (I + H + NH) + 6 * B * H * H,
        transcendentals=B * (H + 1),
        bytes_accessed=4 * (2 * B * H * H + B * (I + 3 * H + NH)
                            + I * H + 2 * H * H + H * NH + 4 * H + NH),
    )

    heads, hactiv, hebb_new = pl.pallas_call(
        functools.partial(network_kernel, num_actions=NA),
        grid=grid,
        in_specs=[
            pl.BlockSpec((bt, I), lambda b: (b, 0)),        # inputs
            pl.BlockSpec((bt, H), lambda b: (b, 0)),        # h
            pl.BlockSpec((bt, H, H), lambda b: (b, 0, 0)),  # hebb
            pl.BlockSpec((I, H), lambda b: (0, 0)),         # wi2h
            pl.BlockSpec((1, H), lambda b: (0, 0)),         # bi2h
            pl.BlockSpec((H, H), lambda b: (0, 0)),         # w
            pl.BlockSpec((H, H), lambda b: (0, 0)),         # alpha
            pl.BlockSpec((H, NH), lambda b: (0, 0)),        # fused head W
            pl.BlockSpec((1, NH), lambda b: (0, 0)),        # fused head b
            pl.BlockSpec((1, H), lambda b: (0, 0)),         # wmf (modfanout W^T)
            pl.BlockSpec((1, H), lambda b: (0, 0)),         # bmf
        ],
        out_specs=(
            pl.BlockSpec((bt, NH), lambda b: (b, 0)),
            pl.BlockSpec((bt, H), lambda b: (b, 0)),
            pl.BlockSpec((bt, H, H), lambda b: (b, 0, 0)),
        ),
        out_shape=(
            jax.ShapeDtypeStruct((B, NH), jnp.float32),
            jax.ShapeDtypeStruct((B, H), jnp.float32),
            jax.ShapeDtypeStruct((B, H, H), jnp.float32),
        ),
        input_output_aliases={2: 2},                        # hebb -> hebb_new
        compiler_params=pltpu.CompilerParams(
            dimension_semantics=("parallel",)),
        cost_estimate=cost,
    )(inputs, h, hebb,
      params["wi2h"], params["bi2h"],
      params["w"], params["alpha"],
      w_heads, b_heads,
      params["wmf"], params["bmf"])

    activout = heads[:, :NA]
    valueout = heads[:, NA:NA + 1]
    return activout, valueout, (hactiv, hebb_new)

# TODO(synk): for multi-step A2C rollouts, move the time loop inside the kernel
# (grid over t, hebb/h in VMEM scratch, write-back at the last step) to avoid
# the per-step (B,H,H) HBM round trip.


# ----------------------------------------------------------------------------
# Deterministic parameter init (shapes follow Network.__init__).
# ----------------------------------------------------------------------------
def init_params(key, isize, hsize, num_actions):
    ks = jax.random.split(key, 12)

    def linear(kw, kb, fan_in, fan_out):
        # nn.Linear default: U(-1/sqrt(fan_in), 1/sqrt(fan_in)); stored transposed.
        bound = 1.0 / jnp.sqrt(jnp.float32(fan_in))
        w = jax.random.uniform(kw, (fan_in, fan_out), jnp.float32, -bound, bound)
        b = jax.random.uniform(kb, (1, fan_out), jnp.float32, -bound, bound)
        return w, b

    wi2h, bi2h = linear(ks[0], ks[1], isize, hsize)
    wh2o, bh2o = linear(ks[2], ks[3], hsize, num_actions)
    wh2v, bh2v = linear(ks[4], ks[5], hsize, 1)
    wh2mod, bh2mod = linear(ks[6], ks[7], hsize, 1)
    wmf, bmf = linear(ks[8], ks[9], 1, hsize)

    w = 0.001 * jax.random.uniform(ks[10], (hsize, hsize), jnp.float32)
    alpha = 0.001 * jax.random.uniform(ks[11], (hsize, hsize), jnp.float32)

    return dict(wi2h=wi2h, bi2h=bi2h, w=w, alpha=alpha,
                wh2o=wh2o, bh2o=bh2o, wh2v=wh2v, bh2v=bh2v,
                wh2mod=wh2mod, bh2mod=bh2mod, wmf=wmf, bmf=bmf)


# ----------------------------------------------------------------------------
# Pure-JAX reference (mirrors the PyTorch forward exactly) for verification.
# ----------------------------------------------------------------------------
def reference_forward(p, inputs, hidden):
    h, hebb = hidden
    w_eff = p["w"][None] + p["alpha"][None] * hebb
    rec = jnp.einsum("bh,bhk->bk", h, w_eff)
    hactiv = jnp.tanh(inputs @ p["wi2h"] + p["bi2h"] + rec)
    activout = hactiv @ p["wh2o"] + p["bh2o"]
    valueout = hactiv @ p["wh2v"] + p["bh2v"]
    mod = jnp.tanh(hactiv @ p["wh2mod"] + p["bh2mod"])
    myeta = mod @ p["wmf"] + p["bmf"]
    deltahebb = h[:, :, None] * hactiv[:, None, :]
    hebb_new = jnp.clip(hebb + myeta[:, None, :] * deltahebb, -2.0, 2.0)
    return activout, valueout, (hactiv, hebb_new)


if __name__ == "__main__":
    B, ISIZE, HSIZE, NUM_ACTIONS = 2, 16, 32, 4

    key = jax.random.PRNGKey(0)
    kp, kx, kh, khebb = jax.random.split(key, 4)

    params = init_params(kp, ISIZE, HSIZE, NUM_ACTIONS)

    inputs = jax.random.normal(kx, (B, ISIZE), jnp.float32)
    h0 = jax.random.normal(kh, (B, HSIZE), jnp.float32) * 0.1
    hebb0 = jax.random.normal(khebb, (B, HSIZE, HSIZE), jnp.float32) * 0.1

    # Reference first (pure JAX), then the Pallas kernel.
    ra, rv, (rh, rhebb) = reference_forward(params, inputs, (h0, hebb0))

    activout, valueout, (hactiv, hebb_new) = jax.block_until_ready(
        network_forward(params, inputs, (h0, hebb0)))

    assert jnp.allclose(activout, ra, atol=1e-4), "activout mismatch"
    assert jnp.allclose(valueout, rv, atol=1e-4), "valueout mismatch"
    assert jnp.allclose(hactiv, rh, atol=1e-4), "hactiv mismatch"
    assert jnp.allclose(hebb_new, rhebb, atol=1e-4), "hebb mismatch"

    print("KERNEL_OK")
</pallas_src>

<mosaic_0001>
module attributes {stable_mosaic.version = 11 : i64} {
  func.func @network_kernel(%arg0: i32, %arg1: memref<2x16xf32, #tpu.memory_space<vmem>>, %arg2: memref<2x32xf32, #tpu.memory_space<vmem>>, %arg3: memref<2x32x32xf32, #tpu.memory_space<vmem>>, %arg4: memref<16x32xf32, #tpu.memory_space<vmem>>, %arg5: memref<1x32xf32, #tpu.memory_space<vmem>>, %arg6: memref<32x32xf32, #tpu.memory_space<vmem>>, %arg7: memref<32x32xf32, #tpu.memory_space<vmem>>, %arg8: memref<32x6xf32, #tpu.memory_space<vmem>>, %arg9: memref<1x6xf32, #tpu.memory_space<vmem>>, %arg10: memref<1x32xf32, #tpu.memory_space<vmem>>, %arg11: memref<1x32xf32, #tpu.memory_space<vmem>>, %arg12: memref<2x6xf32, #tpu.memory_space<vmem>>, %arg13: memref<2x32xf32, #tpu.memory_space<vmem>>, %arg14: memref<2x32x32xf32, #tpu.memory_space<vmem>>) attributes {dimension_semantics = [#tpu.dimension_semantics<parallel>], iteration_bounds = array<i64: 1>, scalar_prefetch = 0 : i64, scratch_operands = 0 : i64, tpu.core_type = #tpu.core_type<tc>, window_params = [{transform_indices = @transform_0, window_bounds = array<i64: 2, 16>}, {transform_indices = @transform_1, window_bounds = array<i64: 2, 32>}, {transform_indices = @transform_2, window_bounds = array<i64: 2, 32, 32>}, {pipeline_mode = #tpu.pipeline_mode<synchronous>, transform_indices = @transform_3, window_bounds = array<i64: 16, 32>}, {pipeline_mode = #tpu.pipeline_mode<synchronous>, transform_indices = @transform_4, window_bounds = array<i64: 1, 32>}, {pipeline_mode = #tpu.pipeline_mode<synchronous>, transform_indices = @transform_5, window_bounds = array<i64: 32, 32>}, {pipeline_mode = #tpu.pipeline_mode<synchronous>, transform_indices = @transform_6, window_bounds = array<i64: 32, 32>}, {pipeline_mode = #tpu.pipeline_mode<synchronous>, transform_indices = @transform_7, window_bounds = array<i64: 32, 6>}, {pipeline_mode = #tpu.pipeline_mode<synchronous>, transform_indices = @transform_8, window_bounds = array<i64: 1, 6>}, {pipeline_mode = #tpu.pipeline_mode<synchronous>, transform_indices = @transform_9, window_bounds = array<i64: 1, 32>}, {pipeline_mode = #tpu.pipeline_mode<synchronous>, transform_indices = @transform_10, window_bounds = array<i64: 1, 32>}, {transform_indices = @transform_11, window_bounds = array<i64: 2, 6>}, {transform_indices = @transform_12, window_bounds = array<i64: 2, 32>}, {transform_indices = @transform_13, window_bounds = array<i64: 2, 32, 32>}]} {
    %c0 = arith.constant 0 : index
    %c0_0 = arith.constant 0 : index
    %0 = vector.load %arg1[%c0, %c0_0] : memref<2x16xf32, #tpu.memory_space<vmem>>, vector<2x16xf32>
    %c0_1 = arith.constant 0 : index
    %c0_2 = arith.constant 0 : index
    %1 = vector.load %arg2[%c0_1, %c0_2] : memref<2x32xf32, #tpu.memory_space<vmem>>, vector<2x32xf32>
    %c0_3 = arith.constant 0 : index
    %c0_4 = arith.constant 0 : index
    %c0_5 = arith.constant 0 : index
    %2 = vector.load %arg3[%c0_3, %c0_4, %c0_5] : memref<2x32x32xf32, #tpu.memory_space<vmem>>, vector<2x32x32xf32>
    %c0_6 = arith.constant 0 : index
    %c0_7 = arith.constant 0 : index
    %3 = vector.load %arg6[%c0_6, %c0_7] : memref<32x32xf32, #tpu.memory_space<vmem>>, vector<32x32xf32>
    %cst = arith.constant dense<0.000000e+00> : vector<2x32xf32>
    %4 = tpu.matmul %1, %3, %cst {dimension_numbers = #tpu.dot_dimension_numbers<[1], [0], [0], [1], [0, 0, 1, 1], [], []>} : vector<2x32xf32>, vector<32x32xf32>, vector<2x32xf32> -> vector<2x32xf32>
    %5 = vector.shape_cast %1 : vector<2x32xf32> to vector<2x32x1xf32>
    %c0_8 = arith.constant 0 : index
    %c0_9 = arith.constant 0 : index
    %6 = vector.load %arg7[%c0_8, %c0_9] : memref<32x32xf32, #tpu.memory_space<vmem>>, vector<32x32xf32>
    %7 = vector.shape_cast %6 : vector<32x32xf32> to vector<1x32x32xf32>
    %8 = vector.broadcast %7 : vector<1x32x32xf32> to vector<2x32x32xf32>
    %9 = arith.mulf %8, %2 : vector<2x32x32xf32>
    %10 = vector.broadcast %5 : vector<2x32x1xf32> to vector<2x32x32xf32>
    %11 = arith.mulf %10, %9 : vector<2x32x32xf32>
    %cst_10 = arith.constant dense<0.000000e+00> : vector<2x32xf32>
    %12 = vector.multi_reduction <add>, %11, %cst_10 [1] : vector<2x32x32xf32> to vector<2x32xf32>
    %13 = arith.addf %4, %12 : vector<2x32xf32>
    %c0_11 = arith.constant 0 : index
    %c0_12 = arith.constant 0 : index
    %14 = vector.load %arg4[%c0_11, %c0_12] : memref<16x32xf32, #tpu.memory_space<vmem>>, vector<16x32xf32>
    %cst_13 = arith.constant dense<0.000000e+00> : vector<2x32xf32>
    %15 = tpu.matmul %0, %14, %cst_13 {dimension_numbers = #tpu.dot_dimension_numbers<[1], [0], [0], [1], [0, 0, 1, 1], [], []>} : vector<2x16xf32>, vector<16x32xf32>, vector<2x32xf32> -> vector<2x32xf32>
    %c0_14 = arith.constant 0 : index
    %c0_15 = arith.constant 0 : index
    %16 = vector.load %arg5[%c0_14, %c0_15] : memref<1x32xf32, #tpu.memory_space<vmem>>, vector<1x32xf32>
    %17 = vector.broadcast %16 : vector<1x32xf32> to vector<2x32xf32>
    %18 = arith.addf %15, %17 : vector<2x32xf32>
    %19 = arith.addf %18, %13 : vector<2x32xf32>
    %20 = math.tanh %19 : vector<2x32xf32>
    %c0_16 = arith.constant 0 : index
    %c0_17 = arith.constant 0 : index
    %21 = vector.load %arg8[%c0_16, %c0_17] : memref<32x6xf32, #tpu.memory_space<vmem>>, vector<32x6xf32>
    %cst_18 = arith.constant dense<0.000000e+00> : vector<2x6xf32>
    %22 = tpu.matmul %20, %21, %cst_18 {dimension_numbers = #tpu.dot_dimension_numbers<[1], [0], [0], [1], [0, 0, 1, 1], [], []>} : vector<2x32xf32>, vector<32x6xf32>, vector<2x6xf32> -> vector<2x6xf32>
    %c0_19 = arith.constant 0 : index
    %c0_20 = arith.constant 0 : index
    %23 = vector.load %arg9[%c0_19, %c0_20] : memref<1x6xf32, #tpu.memory_space<vmem>>, vector<1x6xf32>
    %24 = vector.broadcast %23 : vector<1x6xf32> to vector<2x6xf32>
    %25 = arith.addf %22, %24 : vector<2x6xf32>
    %26 = vector.extract_strided_slice %25 {offsets = [0, 5], sizes = [2, 1], strides = [1, 1]} : vector<2x6xf32> to vector<2x1xf32>
    %27 = math.tanh %26 : vector<2x1xf32>
    %c0_21 = arith.constant 0 : index
    %c0_22 = arith.constant 0 : index
    %28 = vector.load %arg10[%c0_21, %c0_22] : memref<1x32xf32, #tpu.memory_space<vmem>>, vector<1x32xf32>
    %29 = vector.broadcast %27 : vector<2x1xf32> to vector<2x32xf32>
    %30 = vector.broadcast %28 : vector<1x32xf32> to vector<2x32xf32>
    %31 = arith.mulf %29, %30 : vector<2x32xf32>
    %c0_23 = arith.constant 0 : index
    %c0_24 = arith.constant 0 : index
    %32 = vector.load %arg11[%c0_23, %c0_24] : memref<1x32xf32, #tpu.memory_space<vmem>>, vector<1x32xf32>
    %33 = vector.broadcast %32 : vector<1x32xf32> to vector<2x32xf32>
    %34 = arith.addf %31, %33 : vector<2x32xf32>
    %35 = arith.mulf %34, %20 : vector<2x32xf32>
    %36 = vector.shape_cast %1 : vector<2x32xf32> to vector<2x32x1xf32>
    %37 = vector.shape_cast %35 : vector<2x32xf32> to vector<2x1x32xf32>
    %38 = vector.broadcast %36 : vector<2x32x1xf32> to vector<2x32x32xf32>
    %39 = vector.broadcast %37 : vector<2x1x32xf32> to vector<2x32x32xf32>
    %40 = arith.mulf %38, %39 : vector<2x32x32xf32>
    %41 = arith.addf %2, %40 : vector<2x32x32xf32>
    %cst_25 = arith.constant -2.000000e+00 : f32
    %cst_26 = arith.constant 2.000000e+00 : f32
    %42 = vector.broadcast %cst_25 : f32 to vector<2x32x32xf32>
    %43 = arith.maximumf %42, %41 : vector<2x32x32xf32>
    %44 = vector.broadcast %cst_26 : f32 to vector<2x32x32xf32>
    %45 = arith.minimumf %44, %43 : vector<2x32x32xf32>
    %c0_27 = arith.constant 0 : index
    %c0_28 = arith.constant 0 : index
    %c0_29 = arith.constant 0 : index
    %46 = vector.load %arg14[%c0_27, %c0_28, %c0_29] : memref<2x32x32xf32, #tpu.memory_space<vmem>>, vector<2x32x32xf32>
    tpu.vector_store %arg14[%c0_27, %c0_28, %c0_29], %45 {strides = array<i32>} : memref<2x32x32xf32, #tpu.memory_space<vmem>>, vector<2x32x32xf32>,
    %c0_30 = arith.constant 0 : index
    %c0_31 = arith.constant 0 : index
    %47 = vector.load %arg12[%c0_30, %c0_31] : memref<2x6xf32, #tpu.memory_space<vmem>>, vector<2x6xf32>
    tpu.vector_store %arg12[%c0_30, %c0_31], %25 {strides = array<i32>} : memref<2x6xf32, #tpu.memory_space<vmem>>, vector<2x6xf32>,
    %c0_32 = arith.constant 0 : index
    %c0_33 = arith.constant 0 : index
    %48 = vector.load %arg13[%c0_32, %c0_33] : memref<2x32xf32, #tpu.memory_space<vmem>>, vector<2x32xf32>
    tpu.vector_store %arg13[%c0_32, %c0_33], %20 {strides = array<i32>} : memref<2x32xf32, #tpu.memory_space<vmem>>, vector<2x32xf32>,
    return
  }
  func.func @transform_0(%arg0: i32) -> (i32, i32) {
    %c0_i32 = arith.constant 0 : i32
    %c0_i32_0 = arith.constant 0 : i32
    return %arg0, %c0_i32 : i32, i32
  }
  func.func @transform_1(%arg0: i32) -> (i32, i32) {
    %c0_i32 = arith.constant 0 : i32
    %c0_i32_0 = arith.constant 0 : i32
    return %arg0, %c0_i32 : i32, i32
  }
  func.func @transform_2(%arg0: i32) -> (i32, i32, i32) {
    %c0_i32 = arith.constant 0 : i32
    %c0_i32_0 = arith.constant 0 : i32
    %c0_i32_1 = arith.constant 0 : i32
    return %arg0, %c0_i32, %c0_i32_0 : i32, i32, i32
  }
  func.func @transform_3(%arg0: i32) -> (i32, i32) {
    %c0_i32 = arith.constant 0 : i32
    %c0_i32_0 = arith.constant 0 : i32
    %c0_i32_1 = arith.constant 0 : i32
    return %c0_i32, %c0_i32_0 : i32, i32
  }
  func.func @transform_4(%arg0: i32) -> (i32, i32) {
    %c0_i32 = arith.constant 0 : i32
    %c0_i32_0 = arith.constant 0 : i32
    %c0_i32_1 = arith.constant 0 : i32
    return %c0_i32, %c0_i32_0 : i32, i32
  }
  func.func @transform_5(%arg0: i32) -> (i32, i32) {
    %c0_i32 = arith.constant 0 : i32
    %c0_i32_0 = arith.constant 0 : i32
    %c0_i32_1 = arith.constant 0 : i32
    return %c0_i32, %c0_i32_0 : i32, i32
  }
  func.func @transform_6(%arg0: i32) -> (i32, i32) {
    %c0_i32 = arith.constant 0 : i32
    %c0_i32_0 = arith.constant 0 : i32
    %c0_i32_1 = arith.constant 0 : i32
    return %c0_i32, %c0_i32_0 : i32, i32
  }
  func.func @transform_7(%arg0: i32) -> (i32, i32) {
    %c0_i32 = arith.constant 0 : i32
    %c0_i32_0 = arith.constant 0 : i32
    %c0_i32_1 = arith.constant 0 : i32
    return %c0_i32, %c0_i32_0 : i32, i32
  }
  func.func @transform_8(%arg0: i32) -> (i32, i32) {
    %c0_i32 = arith.constant 0 : i32
    %c0_i32_0 = arith.constant 0 : i32
    %c0_i32_1 = arith.constant 0 : i32
    return %c0_i32, %c0_i32_0 : i32, i32
  }
  func.func @transform_9(%arg0: i32) -> (i32, i32) {
    %c0_i32 = arith.constant 0 : i32
    %c0_i32_0 = arith.constant 0 : i32
    %c0_i32_1 = arith.constant 0 : i32
    return %c0_i32, %c0_i32_0 : i32, i32
  }
  func.func @transform_10(%arg0: i32) -> (i32, i32) {
    %c0_i32 = arith.constant 0 : i32
    %c0_i32_0 = arith.constant 0 : i32
    %c0_i32_1 = arith.constant 0 : i32
    return %c0_i32, %c0_i32_0 : i32, i32
  }
  func.func @transform_11(%arg0: i32) -> (i32, i32) {
    %c0_i32 = arith.constant 0 : i32
    %c0_i32_0 = arith.constant 0 : i32
    return %arg0, %c0_i32 : i32, i32
  }
  func.func @transform_12(%arg0: i32) -> (i32, i32) {
    %c0_i32 = arith.constant 0 : i32
    %c0_i32_0 = arith.constant 0 : i32
    return %arg0, %c0_i32 : i32, i32
  }
  func.func @transform_13(%arg0: i32) -> (i32, i32, i32) {
    %c0_i32 = arith.constant 0 : i32
    %c0_i32_0 = arith.constant 0 : i32
    %c0_i32_1 = arith.constant 0 : i32
    return %arg0, %c0_i32, %c0_i32_0 : i32, i32, i32
  }
}

</mosaic_0001>

<bundles_post_ra>
// kernel: tpu_custom_call.1
= control target key start
LH: loop header
LB: loop body
LE: loop exit
PB: predicated region body
PF: predicated region fallthrough
CT: control target
= control target key end

     0   :  { %19 = vsyncpa [#allocation3], 0  ;;  %s958_s0 = inlined_call_operand.vmem [shape: f32[2,16], index: 0, kind: input, shape index: {}]   ;;  %s959_s1 = inlined_call_operand.vmem [shape: f32[2,32], index: 1, kind: input, shape index: {}]   ;;  %s960_s2 = inlined_call_operand.hbm [shape: f32[2,32,32], index: 2, kind: input, shape index: {}, may-alias: {2,13}]   ;;  %s961_s3 = inlined_call_operand.vmem [shape: f32[16,32], index: 3, kind: input, shape index: {}]   ;;  %s962_s4 = inlined_call_operand.vmem [shape: f32[1,32], index: 4, kind: input, shape index: {}]   ;;  %s963_s5 = inlined_call_operand.vmem [shape: f32[32,32], index: 5, kind: input, shape index: {}]   ;;  %s964_s6 = inlined_call_operand.vmem [shape: f32[32,32], index: 6, kind: input, shape index: {}]   ;;  %s965_s7 = inlined_call_operand.vmem [shape: f32[32,6], index: 7, kind: input, shape index: {}]   ;;  %s966_s8 = inlined_call_operand.vmem [shape: f32[1,6], index: 8, kind: input, shape index: {}]   ;;  %s967_s9 = inlined_call_operand.vmem [shape: f32[1,32], index: 9, kind: input, shape index: {}]   ;;  %s968_s10 = inlined_call_operand.vmem [shape: f32[1,32], index: 10, kind: input, shape index: {}]   ;;  %s969_s11 = inlined_call_operand.hbm [shape: f32[2,6], index: 11, kind: output, shape index: {0}]   ;;  %s970_s12 = inlined_call_operand.hbm [shape: f32[2,32], index: 12, kind: output, shape index: {1}]   ;;  %s971_s13 = inlined_call_operand.hbm [shape: f32[2,32,32], index: 13, kind: output, shape index: {2}, may-alias: {2,13}]  }
   0x1   :  { %20 = vsyncpa [#allocation4], 0 }
   0x2   :  { %21 = vsyncpa [#allocation7], 0  ;;  %s705_s25 = smov [#allocation2]  }
   0x3   :  { %s31_s26 = sshll.u32 %s705_s25, 4  ;;  %s32_s26 = int_to_ptr.vmem [resolvable:$true] %s31_s26 }
   0x4   :  { %s627_s27 = scalar_lea.vmem %s32_s26, 1024  ;;  %p632_p1 = scmp.lt.s32.totalorder %s32_s26, %s32_s26 }
   0x5   :  { %p628_p0 = scmp.ne.s32.totalorder %s32_s26, %s627_s27  ;;  %p633_p2 = scmp.lt.s32.totalorder %s627_s27, %s627_s27 }
   0x7   :  { %p634_p3 = por %p633_p2, %p632_p1 }
   0x9   :  { %p635_p4 = pnand %p634_p3, %p628_p0 }
   0xb   :  { %638 = shalt.err (!%p635_p4)
}
   0xc   :  { %s706_s28 = smov 128   ;;  %s707_s29 = smov 8  }
   0xd   :  { %37 = dma.hbm_to_vmem [thread:$0]  %s960_s2, 1024, %s32_s26, [#allocation3], %s706_s28, %s706_s28, %s707_s29  }
   0xe   :  { %699 = dma.done.wait [#allocation3], 1024  }
   0xf   :  { %700 = vsyncadd [#allocation3], 4294966272  ;;  %v71_v0 = vlaneseq  ;;  %v708_v1 = vmov 0.0   ;;  %vm709_vm0 = vmmov 0   ;;  %v70_v5 = vld [vmem:[%s963_s5 + $0x18] sm:$0xff]  ;;  %v69_v6 = vld [vmem:[%s963_s5 + $0x10] sm:$0xff] }
  0x10   :  { %575 = vmatprep.subr.mxu0 %v708_v1  ;;  %586 = vmatprep.subr.mxu1 %v708_v1  ;;  %v235_v7 = vld [vmem:[%s961_s3 + $0x8] sm:$0xff]  ;;  %v234_v8 = vld [vmem:[%s961_s3] sm:$0xff]  ;;  %vm243_vm1 = vcmask 130048   ;;  %vm129_vm2 = vcmask 261120   ;;  %v322_v15 = vld [vmem:[%s965_s7 + $0x18] sm:$0xff]  ;;  %vm158_vm3 = vcmask 1041409  }
  0x11   :  { %590 = vmatprep.mubr.msk.f32.mxu1 %vm709_vm0, %v708_v1  ;;  %583 = vmatprep.mubr.msk.f32.mxu0 %vm709_vm0, %v708_v1  ;;  %v793_v2 = vshrl.u32 %v71_v0, 7  ;;  %v57_v9 = vld [vmem:[%s958_s0] sm:$0x3]  ;;  %v68_v10 = vld [vmem:[%s963_s5 + $0x8] sm:$0xff]  ;;  %v321_v16 = vld [vmem:[%s965_s7 + $0x10] sm:$0xff]  ;;  %vm501_vm4 = vcmask 254976  }
  0x12   :  { %576 = vmatpush3.msra.mxu0 %v70_v5  ;;  %587 = vmatpush3.msra.mxu1 %v235_v7  ;;  %v58_v11 = vld [vmem:[%s959_s1] sm:$0x3]  ;;  %v320_v17 = vld [vmem:[%s965_s7 + $0x8] sm:$0xff]  ;;  %v864_v33 = vld [vmem:[#allocation2 + $0x30] sm:$0xff]  ;;  %vm499_vm5 = vcmask 41984   ;;  %s711_s27 = smov [#allocation6]  }
  0x13   :  { %v796_v3 = vsub.s32 0, %v793_v2  ;;  %v92_v4 = vsub.s32 1, %v793_v2  ;;  %577 = vmatprep.subr.mxu0 %v708_v1  ;;  %588 = vmatprep.subr.mxu1 %v708_v1  ;;  %v67_v14 = vld [vmem:[%s963_s5] sm:$0xff]  ;;  %v849_v24 = vld [vmem:[#allocation2 + $0x28] sm:$0xff]  ;;  %v111_v34 = vld [vmem:[%s964_s6 + $0x10] sm:$0xff]  ;;  %s519_s3 = sshll.u32 %s711_s27, 4  ;;  %s520_s3 = int_to_ptr.vmem [resolvable:$true] %s519_s3 }
  0x14   :  { %578 = vmatpush3.msra.mxu0 %v69_v6  ;;  %589 = vmatpush3.msra.mxu1 %v234_v8  ;;  %v319_v18 = vld [vmem:[%s965_s7] sm:$0xff]  ;;  %v110_v25 = vld [vmem:[%s964_s6 + $0x8] sm:$0xff]  ;;  %v869_v35 = vld [vmem:[#allocation2 + $0x10] sm:$0xff]  ;;  %v119_v42 = vmul.f32 %v111_v34, %v864_v33  ;;  %s712_s0 = smov [#allocation5]   ;;  %s639_s30 = scalar_lea.vmem %s520_s3, 32 }
  0x15   :  { %v74_v12 = vrot.slane %v58_v11, %v796_v3  ;;  %v93_v13 = vrot.slane %v58_v11, %v92_v4  ;;  %579 = vmatprep.subr.mxu0 %v708_v1  ;;  %591 = vmatmul.mubr.msk.f32.vlgmr.msra.gmra.mxu1 %vm243_vm1, %v57_v9  ;;  %v842_v21 = vld [vmem:[#allocation2 + $0x20] sm:$0xff]  ;;  %v856_v27 = vld [vmem:[#allocation2 + $0x8] sm:$0xff]  ;;  %v118_v31 = vmul.f32 %v110_v25, %v849_v24  ;;  %v881_v44 = vld [vmem:[#allocation2 + $0x38] sm:$0xff]  ;;  %s509_s1 = sshll.u32 %s712_s0, 4  ;;  %p640_p5 = scmp.ne.s32.totalorder %s520_s3, %s639_s30  ;;  %s510_s1 = int_to_ptr.vmem [resolvable:$true] %s509_s1 }
  0x16   :  { %580 = vmatpush3.msra.mxu0 %v68_v10  ;;  %593 = vmatprep.subr.mxu1 %v708_v1  ;;  %v109_v22 = vld [vmem:[%s964_s6] sm:$0xff]  ;;  %v114_v32 = vmul.f32 %v110_v25, %v856_v27  ;;  %v115_v43 = vmul.f32 %v111_v34, %v869_v35  ;;  %v112_v45 = vld [vmem:[%s964_s6 + $0x18] sm:$0xff]  ;;  %p644_p6 = scmp.lt.s32.totalorder %s520_s3, %s520_s3  ;;  %p645_p7 = scmp.lt.s32.totalorder %s639_s30, %s639_s30 }
  0x17   :  { %95 = vbcast.lane.b32.xlu1 %v93_v13, 256  ;;  %581 = vmatprep.subr.mxu0 %v708_v1  ;;  %v847_v23 = vld [vmem:[#allocation2] sm:$0xff]  ;;  %v117_v29 = vmul.f32 %v109_v22, %v842_v21  ;;  %v886_v46 = vld [vmem:[#allocation2 + $0x18] sm:$0xff]  ;;  %v120_v49 = vmul.f32 %v112_v45, %v881_v44 }
  0x18   :  { %76 = vbcast.lane.b32.xlu0 %v74_v12, 256  ;;  %582 = vmatpush3.msra.mxu0 %v67_v14  ;;  %v113_v30 = vmul.f32 %v109_v22, %v847_v23  ;;  %v116_v50 = vmul.f32 %v112_v45, %v886_v46  ;;  %p646_p8 = por %p645_p7, %p644_p6 }
  0x19   :  { %584 = vmatmul.mubr.msk.f32.vlgmr.msra.gmra.mxu0 %vm129_vm2, %v58_v11  ;;  %601 = vmatprep.mubr.msk.f32.mxu1 %vm709_vm0, %v708_v1 }
  0x1a   :  { %594 = vmatpush3.msra.mxu1 %v322_v15  ;;  %p647_p9 = pnand %p646_p8, %p640_p5 }
  0x1b   :  { %99 = vbcast.lane.b32.xlu1 %v93_v13, 264  ;;  %595 = vmatprep.subr.mxu1 %v708_v1 }
  0x1c   :  { %80 = vbcast.lane.b32.xlu0 %v74_v12, 264  ;;  %596 = vmatpush3.msra.mxu1 %v321_v16 }
  0x1d   :  { %597 = vmatprep.subr.mxu1 %v708_v1 }
  0x1e   :  { %598 = vmatpush3.msra.mxu1 %v320_v17  ;;  %v548_v17 = vld [vmem:[%s962_s4] ss:$0 sm:$0xff] }
  0x1f   :  { %103 = vbcast.lane.b32.xlu1 %v93_v13, 272  ;;  %599 = vmatprep.subr.mxu1 %v708_v1 }
  0x20   :  { %84 = vbcast.lane.b32.xlu0 %v74_v12, 272  ;;  %600 = vmatpush3.msra.mxu1 %v319_v18 }
  0x23   :  { %107 = vbcast.lane.b32.xlu1 %v93_v13, 280 }
  0x24   :  { %88 = vbcast.lane.b32.xlu0 %v74_v12, 280 }
  0x89   :  { %v838_v19 = vpop.permute.xlu1 %95 }
  0x8a   :  { %v840_v20 = vpop.permute.xlu0 %76  ;;  %v125_v36 = vmul.f32 %v117_v29, %v838_v19 }
  0x8b   :  { %v121_v37 = vmul.f32 %v113_v30, %v840_v20 }
  0x8c   :  { %v143_v47 = vsel %vm129_vm2, %v125_v36, 0.0 }
  0x8d   :  { %v854_v26 = vpop.permute.xlu1 %99  ;;  %v130_v48 = vsel %vm129_vm2, %v121_v37, 0.0 }
  0x8e   :  { %v858_v28 = vpop.permute.xlu0 %80  ;;  %v126_v40 = vmul.f32 %v118_v31, %v854_v26 }
  0x8f   :  { %v122_v41 = vmul.f32 %v114_v32, %v858_v28 }
  0x90   :  { %v144_v51 = vsel %vm129_vm2, %v126_v40, 0.0 }
  0x91   :  { %v873_v38 = vpop.permute.xlu1 %103  ;;  %v131_v52 = vsel %vm129_vm2, %v122_v41, 0.0  ;;  %v145_v57 = vadd.f32 %v144_v51, %v143_v47  ;;  %v710_v41 = vmov 5  }
  0x92   :  { %v875_v39 = vpop.permute.xlu0 %84  ;;  %v127_v53 = vmul.f32 %v119_v42, %v873_v38  ;;  %v132_v58 = vadd.f32 %v131_v52, %v130_v48  ;;  %614 = vset.pattern.permute.xlu0 %v710_v41  ;;  %v550_v42 = vld [vmem:[%s966_s8] ss:$0 sm:$0xff] }
  0x93   :  { %v123_v54 = vmul.f32 %v115_v43, %v875_v39 }
  0x94   :  { %v146_v59 = vsel %vm129_vm2, %v127_v53, 0.0 }
  0x95   :  { %v896_v55 = vpop.permute.xlu1 %107  ;;  %v133_v60 = vsel %vm129_vm2, %v123_v54, 0.0  ;;  %v147_v63 = vadd.f32 %v146_v59, %v145_v57 }
  0x96   :  { %v898_v56 = vpop.permute.xlu0 %88  ;;  %v128_v61 = vmul.f32 %v120_v49, %v896_v55  ;;  %v134_v0 = vadd.f32 %v133_v60, %v132_v58 }
  0x97   :  { %v124_v62 = vmul.f32 %v116_v50, %v898_v56 }
  0x98   :  { %v148_v1 = vsel %vm129_vm2, %v128_v61, 0.0 }
  0x99   :  { %v135_v4 = vsel %vm129_vm2, %v124_v62, 0.0  ;;  %v149_v5 = vadd.f32 %v148_v1, %v147_v63 }
  0x9a   :  { %v136_v6 = vadd.f32 %v135_v4, %v134_v0 }
  0x9b   :  { %v150_v7 = vrot.slane %v149_v5, 4 }
  0x9c   :  { %v137_v8 = vrot.slane %v136_v6, 4 }
  0x9d   :  { %v151_v9 = vadd.f32 %v150_v7, %v149_v5 }
  0x9e   :  { %v138_v10 = vadd.f32 %v137_v8, %v136_v6 }
  0x9f   :  { %v152_v11 = vrot.slane %v151_v9, 2 }
  0xa0   :  { %v139_v12 = vrot.slane %v138_v10, 2 }
  0xa1   :  { %v153_v13 = vadd.f32 %v152_v11, %v151_v9 }
  0xa2   :  { %v140_v14 = vadd.f32 %v139_v12, %v138_v10 }
  0xa3   :  { %v154_v16 = vrot.slane %v153_v13, 1 }
  0xa4   :  { %v141_v15 = vrot.slane %v140_v14, 1 }
  0xa5   :  { %v155_v25 = vadd.f32 %v154_v16, %v153_v13 }
  0xa6   :  { %v142_v22 = vadd.f32 %v141_v15, %v140_v14 }
  0xa8   :  { %v159_v31 = vsel %vm158_vm3, %v155_v25, %v142_v22 }
  0xd5   :  { %v313_v18 = vpop.f32.mrf.mxu1 }
  0xd6   :  { %v314_v30 = vadd.f32 %v548_v17, %v313_v18 }
  0xd7   :  { %v592_v29 = vpop.f32.mrf.mxu1 }
  0xd9   :  { %v230_v32 = vpop.f32.mrf.mxu0 }
  0xda   :  { %v231_v34 = vadd.f32 %v230_v32, %v159_v31 }
  0xdb   :  { %v585_v36 = vpop.f32.mrf.mxu0 }
  0xdc   :  { %v317_v37 = vadd.f32 %v314_v30, %v231_v34 }
  0xde   :  { %615 = vtanh.f32 %v317_v37 }
  0xeb   :  { %v616_v40 = vpop.eup %615 }
  0xec   :  { %602 = vmatmul.mubr.msk.f32.vlgmr.msra.gmra.mxu1 %vm129_vm2, %v616_v40  ;;  %502 = vst.msk [vmem:[#allocation6] sm:$0x3] %vm501_vm4, %v616_v40 }
 0x1ac   :  { %v399_v43 = vpop.f32.mrf.mxu1 }
 0x1ad   :  { %v400_v45 = vadd.f32 %v550_v42, %v399_v43 }
 0x1ae   :  { %v603_v47 = vpop.f32.mrf.mxu1 }
 0x1af   :  { %617 = vtanh.f32 %v400_v45  ;;  %500 = vst.msk [vmem:[#allocation5] sm:$0x3] %vm499_vm5, %v400_v45 }
 0x1bc   :  { %v618_v48 = vpop.eup %617 }
 0x1bd   :  { %407 = vperm.xlu0 %614, %v618_v48  }
 0x1be   :  { %650 = shalt.err (!%p647_p9)
}
 0x1bf   :  { %522 = dma.vmem_to_hbm [thread:$0]  %s520_s3, 32, %s970_s12, [#allocation7]  }
 0x1c0   :  { %s659_s14 = scalar_lea.vmem %s510_s1, 32  ;;  %p664_p11 = scmp.lt.s32.totalorder %s510_s1, %s510_s1 }
 0x1c1   :  { %p660_p10 = scmp.ne.s32.totalorder %s510_s1, %s659_s14  ;;  %p665_p12 = scmp.lt.s32.totalorder %s659_s14, %s659_s14 }
 0x1c3   :  { %p666_p13 = por %p665_p12, %p664_p11 }
 0x1c5   :  { %p667_p0 = pnand %p666_p13, %p660_p10 }
 0x1c7   :  { %670 = shalt.err (!%p667_p0)
}
 0x1c8   :  { %512 = dma.vmem_to_hbm [thread:$0]  %s510_s1, 32, %s969_s11, [#allocation4]   ;;  %v713_v49 = vmov 1966171168   ;;  %v552_v51 = vld [vmem:[%s967_s9] ss:$0 sm:$0xff] }
 0x1c9   :  { %v428_v50 = vunpack.c.l.s4 %v713_v49  ;;  %v553_v53 = vld [vmem:[%s968_s10] ss:$0 sm:$0xff]  ;;  %s714_s9 = smov [#allocation8]  }
 0x1ca   :  { %s528_s10 = sshll.u32 %s714_s9, 4  ;;  %s529_s10 = int_to_ptr.vmem [resolvable:$true] %s528_s10 }
 0x1cb   :  { %v429_v52 = vunpack.c.0.s8 %v428_v50  ;;  %s679_s11 = scalar_lea.vmem %s529_s10, 1024  ;;  %p684_p2 = scmp.lt.s32.totalorder %s529_s10, %s529_s10 }
 0x1cc   :  { %p680_p1 = scmp.ne.s32.totalorder %s529_s10, %s679_s11  ;;  %p685_p3 = scmp.lt.s32.totalorder %s679_s11, %s679_s11 }
 0x1cd   :  { %v432_v58 = vsub.s32 %v429_v52, %v793_v2 }
 0x1ce   :  { %p686_p4 = por %p685_p3, %p684_p2 }
 0x1d0   :  { %p687_p5 = pnand %p686_p4, %p680_p1 }
 0x238   :  { %v408_v54 = vpop.permute.xlu0 %407 }
 0x239   :  { %v416_v57 = vmul.f32 %v552_v51, %v408_v54 }
 0x23b   :  { %v424_v59 = vadd.f32 %v553_v53, %v416_v57 }
 0x23d   :  { %v425_v60 = vmul.f32 %v616_v40, %v424_v59 }
 0x23f   :  { %v433_v61 = vrot.slane %v425_v60, %v432_v58 }
 0x241   :  { %v434_v62 = vcombine.high %v433_v61, %v433_v61  ;;  %v441_v63 = vrot.slane %v433_v61, %v432_v58 }
 0x243   :  { %v448_v0 = vrot.slane %v434_v62, %v432_v58  ;;  %v452_v1 = vrot.slane %v441_v63, %v796_v3 }
 0x245   :  { %v456_v4 = vrot.slane %v448_v0, %v796_v3  ;;  %v459_v5 = vmul.f32 %v452_v1, %v840_v20  ;;  %v460_v6 = vmul.f32 %v452_v1, %v858_v28  ;;  %v461_v7 = vmul.f32 %v452_v1, %v875_v39 }
 0x246   :  { %v462_v8 = vmul.f32 %v452_v1, %v898_v56 }
 0x247   :  { %v463_v2 = vmul.f32 %v456_v4, %v838_v19  ;;  %v464_v9 = vmul.f32 %v456_v4, %v854_v26  ;;  %v465_v10 = vmul.f32 %v456_v4, %v873_v38  ;;  %v466_v11 = vmul.f32 %v456_v4, %v896_v55 }
 0x248   :  { %v467_v12 = vadd.f32 %v459_v5, %v847_v23  ;;  %v468_v3 = vadd.f32 %v460_v6, %v856_v27  ;;  %v469_v20 = vadd.f32 %v461_v7, %v869_v35  ;;  %v470_v28 = vadd.f32 %v462_v8, %v886_v46 }
 0x249   :  { %v471_v39 = vadd.f32 %v463_v2, %v842_v21  ;;  %v472_v19 = vadd.f32 %v464_v9, %v849_v24  ;;  %v473_v26 = vadd.f32 %v465_v10, %v864_v33  ;;  %v474_v38 = vadd.f32 %v466_v11, %v881_v44 }
 0x24a   :  { %v554_v56 = vclamps-f32 %v467_v12, 2.0  ;;  %v555_v55 = vclamps-f32 %v468_v3, 2.0  ;;  %v556_v13 = vclamps-f32 %v469_v20, 2.0  ;;  %v557_v23 = vclamps-f32 %v470_v28, 2.0 }
 0x24b   :  { %v558_v14 = vclamps-f32 %v471_v39, 2.0  ;;  %v559_v27 = vclamps-f32 %v472_v19, 2.0  ;;  %v560_v15 = vclamps-f32 %v473_v26, 2.0  ;;  %v561_v35 = vclamps-f32 %v474_v38, 2.0 }
 0x24c   :  { %491 = vst.msk [vmem:[#allocation8] sm:$0xff] %vm129_vm2, %v554_v56  ;;  %492 = vst.msk [vmem:[#allocation8 + $0x8] sm:$0xff] %vm129_vm2, %v555_v55 }
 0x24d   :  { %493 = vst.msk [vmem:[#allocation8 + $0x10] sm:$0xff] %vm129_vm2, %v556_v13  ;;  %494 = vst.msk [vmem:[#allocation8 + $0x18] sm:$0xff] %vm129_vm2, %v557_v23 }
 0x24e   :  { %495 = vst.msk [vmem:[#allocation8 + $0x20] sm:$0xff] %vm129_vm2, %v558_v14  ;;  %496 = vst.msk [vmem:[#allocation8 + $0x28] sm:$0xff] %vm129_vm2, %v559_v27 }
 0x24f   :  { %497 = vst.msk [vmem:[#allocation8 + $0x30] sm:$0xff] %vm129_vm2, %v560_v15  ;;  %498 = vst.msk [vmem:[#allocation8 + $0x38] sm:$0xff] %vm129_vm2, %v561_v35 }
 0x250   :  { %690 = shalt.err (!%p687_p5)
}
 0x251   :  { %534 = dma.vmem_to_hbm [thread:$0]  %s529_s10, 1024, %s971_s13, [#allocation7], %s706_s28, %s706_s28, %s707_s29  }
 0x252   :  { %701 = dma.done.wait [#allocation4], 32  }
 0x253   :  { %702 = vsyncadd [#allocation4], 4294967264 }
 0x254   :  { %703 = dma.done.wait [#allocation7], 1056  }
 0x255   :  { %704 = vsyncadd [#allocation7], 4294966240 }
 0x256   :  { %544 = vsyncpa [#allocation3], 1 }
 0x257   :  { %545 = vsyncpa [#allocation4], 1 }
 0x258   :  { %546 = vsyncpa [#allocation7], 1 }

</bundles_post_ra>
